<compile_context>
chip_gen: v7x
topology: tpu7x:2x2x1
jax: 0.10.0
libtpu: 0.0.40
codegen_flags: <defaults>
</compile_context>

<pallas_src>
import functools

import jax
import jax.numpy as jnp
from jax import lax
from jax.experimental import pallas as pl
from jax.experimental.pallas import tpu as pltpu


_LARGE_NUM = 1_000_000_000.0


# ----------------------------------------------------------------------------
# Pass 1: one-shot row L2 normalization (F.normalize semantics) + dtype cast.
# ----------------------------------------------------------------------------
def _l2_normalize_kernel(x_ref, o_ref):
    x = x_ref[...].astype(jnp.float32)
    ssq = jnp.sum(x * x, axis=1, keepdims=True)
    # x / max(||x||, 1e-12)  ==  x * rsqrt(max(||x||^2, 1e-24)); rsqrt -> EUP.
    o_ref[...] = (x * lax.rsqrt(jnp.maximum(ssq, jnp.float32(1e-24)))
                  ).astype(o_ref.dtype)


# ----------------------------------------------------------------------------
# Pass 2: flash-style fused Gram / cross-entropy row loss.
# ----------------------------------------------------------------------------
def _simclr_tile_kernel(hr_ref, hc_ref, out_ref, l_sc, pos_sc, *,
                        inv_temp, two_b_true, tm, tn):
    """One (row-tile x column-tile) step over S = Hn @ Hn.T / temp.

    Accumulates sum(exp(s - 1/temp)) (constant-shift LSE; valid because the
    inputs are unit-norm so s <= 1/temp) and the single positive logit per
    row (column (r +- B)).  Diagonal and padded columns get -LARGE_NUM,
    matching `logits - masks * LARGE_NUM` in the reference module.
    On the last column tile the per-row loss  lse - pos  is emitted.
    """
    i = pl.program_id(0)
    j = pl.program_id(1)
    batch = two_b_true // 2
    shift = jnp.float32(inv_temp)

    @pl.when(j == 0)
    def _init():
        l_sc[...] = jnp.zeros_like(l_sc)
        pos_sc[...] = jnp.zeros_like(pos_sc)

    # Gram tile on the MXU: contract the feature axis of both operands
    # directly (equivalent to hr @ hc.T, but with no transposed relayout).
    s = lax.dot_general(
        hr_ref[...], hc_ref[...],
        dimension_numbers=(((1,), (1,)), ((), ())),
        preferred_element_type=jnp.float32) * jnp.float32(inv_temp)

    # Global (row, col) indices of this tile inside the padded (P, P) Gram.
    row = i * tm + lax.broadcasted_iota(jnp.int32, (tm, tn), 0)
    col = j * tn + lax.broadcasted_iota(jnp.int32, (tm, tn), 1)

    # Self-similarity + padded columns -> -LARGE_NUM (single vsel, no one-hot).
    invalid = (row == col) | (col >= two_b_true)
    s = jnp.where(invalid, s - jnp.float32(_LARGE_NUM), s)

    # Constant-shift log-sum-exp accumulation (no online max needed:
    # exp(s - 1/temp) in (0, 1] for valid entries, ~0 for masked ones).
    l_sc[...] += jnp.sum(jnp.exp(s - shift), axis=1, keepdims=True)

    # Positive logit lives at column (row + B) mod 2B; one hit per valid row.
    partner = jnp.where(row < batch, row + batch, row - batch)
    pos_sc[...] += jnp.sum(jnp.where(col == partner, s, jnp.float32(0.0)),
                           axis=1, keepdims=True)

    @pl.when(j == pl.num_programs(1) - 1)
    def _finalize():
        out_ref[...] = jnp.log(l_sc[...]) + shift - pos_sc[...]


# ----------------------------------------------------------------------------
# Tiling plan.
# ----------------------------------------------------------------------------
def _round_up(x, m):
    return ((x + m - 1) // m) * m


def _plan_tiles(two_b, dim, itemsize):
    """Return (padded_rows, tm, tn, col_buffers).

    padded_rows is a multiple of both tm and tn; tm/tn are MXU/lane aligned.
    Sized so  2*tm*D + nbuf*tn*D  blocks plus the (tm,tn) f32 temporaries stay
    under ~40 MiB (safe on v7x's 64 MiB VMEM; ample on v5e/v6e's 128 MiB).
    """
    if two_b <= 256:
        p = _round_up(two_b, 128)
        return p, p, p, 2

    p = _round_up(two_b, 512)
    budget = 40 * 1024 * 1024
    candidates = ((512, 512, 3), (512, 512, 2), (256, 512, 2),
                  (256, 256, 2), (128, 256, 2), (128, 128, 2))
    tm, tn, nbuf = candidates[-1]
    for ctm, ctn, cnb in candidates:
        blocks = (2 * ctm * dim + cnb * ctn * dim) * itemsize
        temps = 3 * ctm * ctn * 4          # s tile, exp tile, mask/iota temps
        if blocks + temps <= budget:
            tm, tn, nbuf = ctm, ctn, cnb
            break
    if p // tm < 2:                        # keep both v7x TensorCores busy
        tm //= 2
    return p, tm, tn, nbuf


# ----------------------------------------------------------------------------
# Public wrapper.
# ----------------------------------------------------------------------------
def simclr_loss(hidden, idx, temp, *, matmul_dtype=jnp.bfloat16):
    """SimCLR forward loss (single-device path of the PyTorch module).

    `idx` is unused by the reference forward (kept for call parity).
    matmul_dtype=bf16 feeds the MXU in bf16 on all TPU generations with f32
    accumulation; pass jnp.float32 for bit-tight agreement with f32 math.
    """
    # TODO(synk): distributed=True branch raises NotImplementedError in the
    # PyTorch module as well; only the single-device path is implemented.
    del idx
    two_b, dim = hidden.shape
    batch = two_b // 2
    assert two_b == 2 * batch, "hidden must stack two views: shape (2B, D)"

    itemsize = jnp.dtype(matmul_dtype).itemsize
    p, tm, tn, nbuf = _plan_tiles(two_b, dim, itemsize)

    h = hidden
    if p != two_b:
        h = jnp.pad(hidden, ((0, p - two_b), (0, 0)))

    # ---- Pass 1: normalize once, store in matmul_dtype ----------------------
    hn = pl.pallas_call(
        _l2_normalize_kernel,
        out_shape=jax.ShapeDtypeStruct((p, dim), matmul_dtype),
        grid_spec=pltpu.PrefetchScalarGridSpec(
            num_scalar_prefetch=0,
            grid=(p // tm,),
            in_specs=[pl.BlockSpec((tm, dim), lambda i: (i, 0))],
            out_specs=pl.BlockSpec((tm, dim), lambda i: (i, 0))),
        compiler_params=pltpu.CompilerParams(
            dimension_semantics=("parallel",)),
    )(h)

    # ---- Pass 2: fused Gram + per-row cross-entropy --------------------------
    grid = (p // tm, p // tn)
    row_spec = pl.BlockSpec((tm, dim), lambda i, j: (i, 0))
    if nbuf > 2 and grid[1] >= nbuf:
        col_spec = pl.BlockSpec((tn, dim), lambda i, j: (j, 0),
                                pipeline_mode=pl.Buffered(nbuf))
    else:
        col_spec = pl.BlockSpec((tn, dim), lambda i, j: (j, 0))

    kernel = functools.partial(
        _simclr_tile_kernel,
        inv_temp=float(1.0 / float(temp)),
        two_b_true=two_b, tm=tm, tn=tn)

    per_row = pl.pallas_call(
        kernel,
        out_shape=jax.ShapeDtypeStruct((p, 1), jnp.float32),
        grid_spec=pltpu.PrefetchScalarGridSpec(
            num_scalar_prefetch=0,
            grid=grid,
            in_specs=[row_spec, col_spec],
            out_specs=pl.BlockSpec((tm, 1), lambda i, j: (i, 0)),
            scratch_shapes=[
                pltpu.VMEM((tm, 1), jnp.float32),   # running sum of exp
                pltpu.VMEM((tm, 1), jnp.float32),   # positive logit
            ]),
        compiler_params=pltpu.CompilerParams(
            dimension_semantics=("parallel", "arbitrary"),
            vmem_limit_bytes=48 * 1024 * 1024),
    )(hn, hn)

    # mean over the 2B real rows == (loss_a + loss_b) / 2
    return jnp.mean(per_row[:two_b, 0])


# ----------------------------------------------------------------------------
# Pure-JAX reference (port of the PyTorch module) for correctness checks.
# ----------------------------------------------------------------------------
def _reference_loss(hidden, temp):
    b = hidden.shape[0] // 2
    h1, h2 = hidden[:b], hidden[b:]
    h1 = h1 / jnp.maximum(jnp.linalg.norm(h1, axis=1, keepdims=True), 1e-12)
    h2 = h2 / jnp.maximum(jnp.linalg.norm(h2, axis=1, keepdims=True), 1e-12)
    masks = jnp.eye(b, dtype=jnp.float32)
    laa = h1 @ h1.T / temp - masks * _LARGE_NUM
    lbb = h2 @ h2.T / temp - masks * _LARGE_NUM
    lab = h1 @ h2.T / temp
    lba = h2 @ h1.T / temp
    labels = jnp.arange(b)

    def ce(logits):
        lse = jax.nn.logsumexp(logits, axis=1)
        return jnp.mean(lse - logits[jnp.arange(b), labels])

    return (ce(jnp.concatenate([lab, laa], axis=1)) +
            ce(jnp.concatenate([lba, lbb], axis=1))) / 2.0


if __name__ == "__main__":
    key = jax.random.PRNGKey(0)

    # --- small shape (single tile, padded 16 -> 128 rows) --------------------
    batch_size, dim, temp = 8, 32, 0.1
    k1, k2 = jax.random.split(key)
    hidden = jax.random.normal(k1, (2 * batch_size, dim), dtype=jnp.float32)
    idx = jnp.arange(batch_size, dtype=jnp.int32)   # unused by forward

    ref = _reference_loss(hidden, temp)

    loss_f32 = simclr_loss(hidden, idx, temp, matmul_dtype=jnp.float32)
    jax.block_until_ready(loss_f32)
    assert jnp.allclose(loss_f32, ref, rtol=1e-4, atol=1e-4), (loss_f32, ref)

    loss_bf16 = simclr_loss(hidden, idx, temp)      # default bf16 MXU path
    jax.block_until_ready(loss_bf16)
    assert jnp.allclose(loss_bf16, ref, rtol=5e-2, atol=5e-2), (loss_bf16, ref)

    # --- larger, non-divisible shape (1200 rows -> padded 1536, 3x3 grid,
    #     exercises padding mask, megacore split and Buffered(3) column stream)
    batch_size2, dim2 = 600, 256
    hidden2 = jax.random.normal(k2, (2 * batch_size2, dim2), dtype=jnp.float32)
    idx2 = jnp.arange(batch_size2, dtype=jnp.int32)

    ref2 = _reference_loss(hidden2, temp)

    loss2_f32 = simclr_loss(hidden2, idx2, temp, matmul_dtype=jnp.float32)
    jax.block_until_ready(loss2_f32)
    assert jnp.allclose(loss2_f32, ref2, rtol=1e-4, atol=1e-4), (loss2_f32, ref2)

    loss2_bf16 = simclr_loss(hidden2, idx2, temp)
    jax.block_until_ready(loss2_bf16)
    assert jnp.allclose(loss2_bf16, ref2, rtol=5e-2, atol=5e-2), (loss2_bf16, ref2)

    print("KERNEL_OK")
</pallas_src>

<mosaic_0001>
module attributes {stable_mosaic.version = 11 : i64} {
  func.func @_l2_normalize_kernel(%arg0: i32, %arg1: memref<128x32xf32, #tpu.memory_space<vmem>>, %arg2: memref<128x32xf32, #tpu.memory_space<vmem>>) attributes {dimension_semantics = [#tpu.dimension_semantics<parallel>], iteration_bounds = array<i64: 1>, scalar_prefetch = 0 : i64, scratch_operands = 0 : i64, tpu.core_type = #tpu.core_type<tc>, window_params = [{transform_indices = @transform_0, window_bounds = array<i64: 128, 32>}, {transform_indices = @transform_1, window_bounds = array<i64: 128, 32>}]} {
    %c0 = arith.constant 0 : index
    %c0_0 = arith.constant 0 : index
    %0 = vector.load %arg1[%c0, %c0_0] : memref<128x32xf32, #tpu.memory_space<vmem>>, vector<128x32xf32>
    %1 = arith.mulf %0, %0 : vector<128x32xf32>
    %cst = arith.constant dense<0.000000e+00> : vector<128xf32>
    %2 = vector.multi_reduction <add>, %1, %cst [1] : vector<128x32xf32> to vector<128xf32>
    %3 = vector.shape_cast %2 : vector<128xf32> to vector<128x1xf32>
    %cst_1 = arith.constant 1.000000e-24 : f32
    %4 = vector.broadcast %cst_1 : f32 to vector<128x1xf32>
    %5 = arith.maximumf %3, %4 : vector<128x1xf32>
    %6 = math.rsqrt %5 : vector<128x1xf32>
    %7 = vector.broadcast %6 : vector<128x1xf32> to vector<128x32xf32>
    %8 = arith.mulf %0, %7 : vector<128x32xf32>
    %c0_2 = arith.constant 0 : index
    %c0_3 = arith.constant 0 : index
    %9 = vector.load %arg2[%c0_2, %c0_3] : memref<128x32xf32, #tpu.memory_space<vmem>>, vector<128x32xf32>
    tpu.vector_store %arg2[%c0_2, %c0_3], %8 {strides = array<i32>} : memref<128x32xf32, #tpu.memory_space<vmem>>, vector<128x32xf32>,
    return
  }
  func.func @transform_0(%arg0: i32) -> (i32, i32) {
    %c0_i32 = arith.constant 0 : i32
    %c0_i32_0 = arith.constant 0 : i32
    return %arg0, %c0_i32 : i32, i32
  }
  func.func @transform_1(%arg0: i32) -> (i32, i32) {
    %c0_i32 = arith.constant 0 : i32
    %c0_i32_0 = arith.constant 0 : i32
    return %arg0, %c0_i32 : i32, i32
  }
}

</mosaic_0001>

<bundles_post_ra>
// kernel: tpu_custom_call.1
= control target key start
LH: loop header
LB: loop body
LE: loop exit
PB: predicated region body
PF: predicated region fallthrough
CT: control target
= control target key end

     0   :  { %vm40_vm0 = vcmask 261120   ;;  %s407_s0 = inlined_call_operand.vmem [shape: f32[128,32], index: 0, kind: input, shape index: {}]   ;;  %s408_s1 = inlined_call_operand.vmem [shape: f32[128,32], index: 1, kind: output, shape index: {}]  }
   0x1   :  { %v202_v0 = vld [vmem:[%s407_s0 + $0x10] sm:$0xff]  ;;  %v207_v1 = vld [vmem:[%s407_s0] sm:$0xff]  ;;  %v212_v2 = vld [vmem:[%s407_s0 + $0x18] sm:$0xff] }
   0x2   :  { %v26_v3 = vmul.f32 %v202_v0, %v202_v0  ;;  %v24_v4 = vmul.f32 %v207_v1, %v207_v1  ;;  %v27_v5 = vmul.f32 %v212_v2, %v212_v2  ;;  %v223_v6 = vld [vmem:[%s407_s0 + $0x8] sm:$0xff]  ;;  %v235_v9 = vld [vmem:[%s407_s0 + $0x20] sm:$0xff]  ;;  %v248_v16 = vld [vmem:[%s407_s0 + $0x38] sm:$0xff] }
   0x3   :  { %v25_v7 = vmul.f32 %v223_v6, %v223_v6  ;;  %v230_v8 = vld [vmem:[%s407_s0 + $0x28] sm:$0xff]  ;;  %v28_v15 = vmul.f32 %v235_v9, %v235_v9  ;;  %v253_v17 = vld [vmem:[%s407_s0 + $0x30] sm:$0xff]  ;;  %v31_v20 = vmul.f32 %v248_v16, %v248_v16  ;;  %v269_v23 = vld [vmem:[%s407_s0 + $0x40] sm:$0xff] }
   0x4   :  { %v47_v10 = vsel %vm40_vm0, %v26_v3, 0.0  ;;  %v41_v11 = vsel %vm40_vm0, %v24_v4, 0.0  ;;  %v50_v12 = vsel %vm40_vm0, %v27_v5, 0.0  ;;  %v29_v14 = vmul.f32 %v230_v8, %v230_v8  ;;  %v264_v22 = vld [vmem:[%s407_s0 + $0x48] sm:$0xff]  ;;  %v280_v28 = vld [vmem:[%s407_s0 + $0x58] sm:$0xff]  ;;  %v285_v29 = vld [vmem:[%s407_s0 + $0x50] sm:$0xff] }
   0x5   :  { %48 = vadd.xlane.f32.xlu1 %v47_v10  ;;  %42 = vadd.xlane.f32.xlu0 %v41_v11  ;;  %v44_v13 = vsel %vm40_vm0, %v25_v7, 0.0  ;;  %v53_v19 = vsel %vm40_vm0, %v28_v15, 0.0  ;;  %v30_v21 = vmul.f32 %v253_v17, %v253_v17  ;;  %v62_v24 = vsel %vm40_vm0, %v31_v20, 0.0  ;;  %v296_v34 = vld [vmem:[%s407_s0 + $0x68] sm:$0xff]  ;;  %v301_v35 = vld [vmem:[%s407_s0 + $0x60] sm:$0xff]  ;;  %v312_v40 = vld [vmem:[%s407_s0 + $0x78] sm:$0xff] }
   0x6   :  { %v56_v18 = vsel %vm40_vm0, %v29_v14, 0.0  ;;  %v33_v26 = vmul.f32 %v264_v22, %v264_v22  ;;  %v32_v27 = vmul.f32 %v269_v23, %v269_v23  ;;  %v35_v32 = vmul.f32 %v280_v28, %v280_v28  ;;  %v317_v41 = vld [vmem:[%s407_s0 + $0x70] sm:$0xff] }
   0x7   :  { %v59_v25 = vsel %vm40_vm0, %v30_v21, 0.0  ;;  %v34_v33 = vmul.f32 %v285_v29, %v285_v29  ;;  %v37_v38 = vmul.f32 %v296_v34, %v296_v34  ;;  %v36_v39 = vmul.f32 %v301_v35, %v301_v35 }
   0x8   :  { %v68_v30 = vsel %vm40_vm0, %v33_v26, 0.0  ;;  %v65_v31 = vsel %vm40_vm0, %v32_v27, 0.0  ;;  %v74_v36 = vsel %vm40_vm0, %v35_v32, 0.0  ;;  %v39_v44 = vmul.f32 %v312_v40, %v312_v40 }
   0x9   :  { %51 = vadd.xlane.f32.xlu1 %v50_v12  ;;  %45 = vadd.xlane.f32.xlu0 %v44_v13  ;;  %v71_v37 = vsel %vm40_vm0, %v34_v33, 0.0  ;;  %v80_v42 = vsel %vm40_vm0, %v37_v38, 0.0  ;;  %v77_v43 = vsel %vm40_vm0, %v36_v39, 0.0  ;;  %v38_v45 = vmul.f32 %v317_v41, %v317_v41 }
   0xa   :  { %v86_v46 = vsel %vm40_vm0, %v39_v44, 0.0 }
   0xb   :  { %v83_v47 = vsel %vm40_vm0, %v38_v45, 0.0 }
   0xd   :  { %57 = vadd.xlane.f32.xlu1 %v56_v18  ;;  %54 = vadd.xlane.f32.xlu0 %v53_v19 }
  0x11   :  { %63 = vadd.xlane.f32.xlu1 %v62_v24  ;;  %60 = vadd.xlane.f32.xlu0 %v59_v25 }
  0x15   :  { %69 = vadd.xlane.f32.xlu1 %v68_v30  ;;  %66 = vadd.xlane.f32.xlu0 %v65_v31 }
  0x19   :  { %75 = vadd.xlane.f32.xlu1 %v74_v36  ;;  %72 = vadd.xlane.f32.xlu0 %v71_v37 }
  0x1d   :  { %81 = vadd.xlane.f32.xlu1 %v80_v42  ;;  %78 = vadd.xlane.f32.xlu0 %v77_v43 }
  0x21   :  { %87 = vadd.xlane.f32.xlu1 %v86_v46  ;;  %84 = vadd.xlane.f32.xlu0 %v83_v47 }
  0x92   :  { %v49_v48 = vpop.xlane.xlu1 %48  ;;  %v43_v49 = vpop.xlane.xlu0 %42 }
  0x93   :  { %v91_v50 = vmax.f32 %v49_v48, 1e-24  ;;  %v89_v51 = vmax.f32 %v43_v49, 1e-24 }
  0x95   :  { %157 = vrsqrt.f32 %v91_v50 }
  0x96   :  { %159 = vrsqrt.f32 %v89_v51  ;;  %v52_v52 = vpop.xlane.xlu1 %51  ;;  %v46_v53 = vpop.xlane.xlu0 %45 }
  0x97   :  { %v92_v54 = vmax.f32 %v52_v52, 1e-24  ;;  %v90_v55 = vmax.f32 %v46_v53, 1e-24 }
  0x99   :  { %161 = vrsqrt.f32 %v92_v54 }
  0x9a   :  { %163 = vrsqrt.f32 %v90_v55  ;;  %v58_v56 = vpop.xlane.xlu1 %57  ;;  %v55_v57 = vpop.xlane.xlu0 %54 }
  0x9b   :  { %v94_v58 = vmax.f32 %v58_v56, 1e-24  ;;  %v93_v59 = vmax.f32 %v55_v57, 1e-24 }
  0x9d   :  { %165 = vrsqrt.f32 %v94_v58 }
  0x9e   :  { %167 = vrsqrt.f32 %v93_v59  ;;  %v64_v60 = vpop.xlane.xlu1 %63  ;;  %v61_v61 = vpop.xlane.xlu0 %60 }
  0x9f   :  { %v158_v62 = vpop.eup %157  ;;  %v96_v63 = vmax.f32 %v64_v60, 1e-24  ;;  %v95_v3 = vmax.f32 %v61_v61, 1e-24 }
  0xa0   :  { %v160_v4 = vpop.eup %159  ;;  %v123_v5 = vmul.f32 %v158_v62, %v202_v0 }
  0xa1   :  { %v121_v7 = vmul.f32 %v160_v4, %v207_v1  ;;  %169 = vrsqrt.f32 %v96_v63 }
  0xa2   :  { %139 = vst.msk [vmem:[%s408_s1 + $0x10] sm:$0xff] %vm40_vm0, %v123_v5  ;;  %171 = vrsqrt.f32 %v95_v3  ;;  %v70_v10 = vpop.xlane.xlu1 %69  ;;  %v67_v11 = vpop.xlane.xlu0 %66 }
  0xa3   :  { %v162_v12 = vpop.eup %161  ;;  %137 = vst.msk [vmem:[%s408_s1] sm:$0xff] %vm40_vm0, %v121_v7  ;;  %v98_v13 = vmax.f32 %v70_v10, 1e-24  ;;  %v97_v14 = vmax.f32 %v67_v11, 1e-24 }
  0xa4   :  { %v164_v0 = vpop.eup %163  ;;  %v124_v1 = vmul.f32 %v162_v12, %v212_v2 }
  0xa5   :  { %v122_v15 = vmul.f32 %v164_v0, %v223_v6  ;;  %173 = vrsqrt.f32 %v98_v13 }
  0xa6   :  { %140 = vst.msk [vmem:[%s408_s1 + $0x18] sm:$0xff] %vm40_vm0, %v124_v1  ;;  %175 = vrsqrt.f32 %v97_v14  ;;  %v76_v18 = vpop.xlane.xlu1 %75  ;;  %v73_v19 = vpop.xlane.xlu0 %72 }
  0xa7   :  { %v166_v20 = vpop.eup %165  ;;  %138 = vst.msk [vmem:[%s408_s1 + $0x8] sm:$0xff] %vm40_vm0, %v122_v15  ;;  %v100_v21 = vmax.f32 %v76_v18, 1e-24  ;;  %v99_v24 = vmax.f32 %v73_v19, 1e-24 }
  0xa8   :  { %v168_v2 = vpop.eup %167  ;;  %v126_v6 = vmul.f32 %v166_v20, %v230_v8 }
  0xa9   :  { %v125_v25 = vmul.f32 %v168_v2, %v235_v9  ;;  %177 = vrsqrt.f32 %v100_v21 }
  0xaa   :  { %142 = vst.msk [vmem:[%s408_s1 + $0x28] sm:$0xff] %vm40_vm0, %v126_v6  ;;  %179 = vrsqrt.f32 %v99_v24  ;;  %v82_v26 = vpop.xlane.xlu1 %81  ;;  %v79_v27 = vpop.xlane.xlu0 %78 }
  0xab   :  { %v170_v30 = vpop.eup %169  ;;  %141 = vst.msk [vmem:[%s408_s1 + $0x20] sm:$0xff] %vm40_vm0, %v125_v25  ;;  %v102_v31 = vmax.f32 %v82_v26, 1e-24  ;;  %v101_v32 = vmax.f32 %v79_v27, 1e-24 }
  0xac   :  { %v172_v8 = vpop.eup %171  ;;  %v128_v9 = vmul.f32 %v170_v30, %v248_v16 }
  0xad   :  { %v127_v33 = vmul.f32 %v172_v8, %v253_v17  ;;  %181 = vrsqrt.f32 %v102_v31 }
  0xae   :  { %144 = vst.msk [vmem:[%s408_s1 + $0x38] sm:$0xff] %vm40_vm0, %v128_v9  ;;  %183 = vrsqrt.f32 %v101_v32  ;;  %v88_v36 = vpop.xlane.xlu1 %87  ;;  %v85_v37 = vpop.xlane.xlu0 %84 }
  0xaf   :  { %v174_v38 = vpop.eup %173  ;;  %143 = vst.msk [vmem:[%s408_s1 + $0x30] sm:$0xff] %vm40_vm0, %v127_v33  ;;  %v104_v39 = vmax.f32 %v88_v36, 1e-24  ;;  %v103_v42 = vmax.f32 %v85_v37, 1e-24 }
  0xb0   :  { %v176_v16 = vpop.eup %175  ;;  %v130_v17 = vmul.f32 %v174_v38, %v264_v22 }
  0xb1   :  { %v129_v43 = vmul.f32 %v176_v16, %v269_v23  ;;  %185 = vrsqrt.f32 %v104_v39 }
  0xb2   :  { %146 = vst.msk [vmem:[%s408_s1 + $0x48] sm:$0xff] %vm40_vm0, %v130_v17  ;;  %187 = vrsqrt.f32 %v103_v42 }
  0xb3   :  { %v178_v44 = vpop.eup %177  ;;  %145 = vst.msk [vmem:[%s408_s1 + $0x40] sm:$0xff] %vm40_vm0, %v129_v43 }
  0xb4   :  { %v180_v45 = vpop.eup %179  ;;  %v132_v46 = vmul.f32 %v178_v44, %v280_v28 }
  0xb5   :  { %v131_v22 = vmul.f32 %v180_v45, %v285_v29 }
  0xb6   :  { %148 = vst.msk [vmem:[%s408_s1 + $0x58] sm:$0xff] %vm40_vm0, %v132_v46 }
  0xb7   :  { %v182_v23 = vpop.eup %181  ;;  %147 = vst.msk [vmem:[%s408_s1 + $0x50] sm:$0xff] %vm40_vm0, %v131_v22 }
  0xb8   :  { %v184_v47 = vpop.eup %183  ;;  %v134_v48 = vmul.f32 %v182_v23, %v296_v34 }
  0xb9   :  { %v133_v49 = vmul.f32 %v184_v47, %v301_v35 }
  0xba   :  { %150 = vst.msk [vmem:[%s408_s1 + $0x68] sm:$0xff] %vm40_vm0, %v134_v48 }
  0xbb   :  { %v186_v28 = vpop.eup %185  ;;  %149 = vst.msk [vmem:[%s408_s1 + $0x60] sm:$0xff] %vm40_vm0, %v133_v49 }
  0xbc   :  { %v188_v29 = vpop.eup %187  ;;  %v136_v50 = vmul.f32 %v186_v28, %v312_v40 }
  0xbd   :  { %v135_v51 = vmul.f32 %v188_v29, %v317_v41 }
  0xbe   :  { %152 = vst.msk [vmem:[%s408_s1 + $0x78] sm:$0xff] %vm40_vm0, %v136_v50 }
  0xbf   :  { %151 = vst.msk [vmem:[%s408_s1 + $0x70] sm:$0xff] %vm40_vm0, %v135_v51 }

</bundles_post_ra>
